<compile_context>
chip_gen: v7x
topology: tpu7x:2x2x1
jax: 0.10.0
libtpu: 0.0.40
codegen_flags: <defaults>
</compile_context>

<pallas_src>
import jax
import jax.numpy as jnp
from jax.experimental import pallas as pl
from jax.experimental.pallas import tpu as pltpu


def _erf_exact_f32(x):
    # Abramowitz & Stegun 7.1.26 rational approximation of erf, |abs err| <= 1.5e-7.
    # Uses only VPU/EUP-supported ops (abs, mul, add, div, exp, where).
    a1 = 0.254829592
    a2 = -0.284496736
    a3 = 1.421413741
    a4 = -1.453152027
    a5 = 1.061405429
    p = 0.3275911
    ax = jnp.abs(x)
    t = 1.0 / (1.0 + p * ax)
    poly = ((((a5 * t + a4) * t + a3) * t + a2) * t + a1) * t
    y = 1.0 - poly * jnp.exp(-ax * ax)
    return jnp.where(x >= 0, y, -y)


def _gelu_exact(x):
    # Exact GELU: 0.5 * x * (1 + erf(x / sqrt(2))) — matches torch.nn.GELU().
    return 0.5 * x * (1.0 + _erf_exact_f32(x * 0.7071067811865476))


def feed_forward_kernel(x_ref, w1_ref, b1_ref, w2_ref, b2_ref, out_ref):
    # x: [TB, d_model], w1: [d_model, d_ff], b1: [1, d_ff],
    # w2: [d_ff, d_model], b2: [1, d_model], out: [TB, d_model]
    x = x_ref[...]
    h = jnp.dot(x, w1_ref[...], preferred_element_type=jnp.float32) + b1_ref[...]
    h = _gelu_exact(h)
    out = jnp.dot(h, w2_ref[...], preferred_element_type=jnp.float32) + b2_ref[...]
    out_ref[...] = out.astype(out_ref.dtype)


def _round_up(n, m):
    return ((n + m - 1) // m) * m


def feed_forward(x, w1_t, b1, w2_t, b2, *, block_rows=256):
    """
    x:    [..., d_model]      float32
    w1_t: [d_model, d_ff]     float32  (linear1.weight.T — pre-transposed once at init)
    b1:   [d_ff]              float32
    w2_t: [d_ff, d_model]     float32  (linear2.weight.T — pre-transposed once at init)
    b2:   [d_model]           float32
    returns: same shape as x
    """
    orig_shape = x.shape
    d_model = orig_shape[-1]
    d_ff = w1_t.shape[1]

    x2 = x.reshape(-1, d_model)
    n_rows = x2.shape[0]

    # Row-tile size: multiple of 8 sublanes, capped so per-step VMEM stays small.
    tb = min(block_rows, _round_up(n_rows, 8))
    n_pad = _round_up(n_rows, tb)
    if n_pad != n_rows:
        x2 = jnp.pad(x2, ((0, n_pad - n_rows), (0, 0)))
    grid = (n_pad // tb,)

    b1_2d = b1.reshape(1, d_ff)
    b2_2d = b2.reshape(1, d_model)

    # Advisory cost for XLA's scheduler (two matmuls + erf/exp per hidden element).
    flops = 2 * n_pad * d_model * d_ff * 2
    transcendentals = n_pad * d_ff
    bytes_accessed = 4 * (2 * n_pad * d_model + n_pad * d_ff
                          + 2 * d_model * d_ff + d_ff + d_model)

    out = pl.pallas_call(
        feed_forward_kernel,
        out_shape=jax.ShapeDtypeStruct((n_pad, d_model), x.dtype),
        grid_spec=pltpu.PrefetchScalarGridSpec(
            num_scalar_prefetch=0,
            grid=grid,
            in_specs=[
                pl.BlockSpec((tb, d_model), lambda i: (i, 0)),      # streamed rows
                pl.BlockSpec((d_model, d_ff), lambda i: (0, 0)),    # resident W1^T
                pl.BlockSpec((1, d_ff), lambda i: (0, 0)),          # resident b1
                pl.BlockSpec((d_ff, d_model), lambda i: (0, 0)),    # resident W2^T
                pl.BlockSpec((1, d_model), lambda i: (0, 0)),       # resident b2
            ],
            out_specs=pl.BlockSpec((tb, d_model), lambda i: (i, 0)),
        ),
        compiler_params=pltpu.CompilerParams(
            # Rows are independent -> shard grid steps across v7x's 2 TCs.
            dimension_semantics=("parallel",),
            # NOTE: for large d_model/d_ff (weights >~32 MiB) set
            # vmem_limit_bytes explicitly and/or add a d_ff/d_model tile axis.
        ),
        cost_estimate=pl.CostEstimate(
            flops=flops,
            transcendentals=transcendentals,
            bytes_accessed=bytes_accessed,
        ),
    )(x2, w1_t, b1_2d, w2_t, b2_2d)

    if n_pad != n_rows:
        out = out[:n_rows]
    return out.reshape(orig_shape)


if __name__ == "__main__":
    # Small shapes consistent with the module's forward: x is [batch, seq, d_model].
    # d_model / d_ff chosen as multiples of 128 for lane-dense stores.
    B, S, d_model, d_ff = 2, 8, 128, 256

    key = jax.random.PRNGKey(0)
    kx, kw1, kb1, kw2, kb2 = jax.random.split(key, 5)

    x = jax.random.normal(kx, (B, S, d_model), dtype=jnp.float32)

    # Parameters in PyTorch nn.Linear layout (weight: [out_features, in_features]).
    bound1 = 1.0 / (d_model ** 0.5)
    w1 = jax.random.uniform(kw1, (d_ff, d_model), jnp.float32, -bound1, bound1)
    b1 = jax.random.uniform(kb1, (d_ff,), jnp.float32, -bound1, bound1)
    bound2 = 1.0 / (d_ff ** 0.5)
    w2 = jax.random.uniform(kw2, (d_model, d_ff), jnp.float32, -bound2, bound2)
    b2 = jax.random.uniform(kb2, (d_model,), jnp.float32, -bound2, bound2)

    # Hoisted out of the per-call path (done once at "init").
    w1_t = w1.T   # [d_model, d_ff]
    w2_t = w2.T   # [d_ff, d_model]

    # block_rows=8 so the 16 flattened rows exercise a 2-step pipelined grid.
    out = feed_forward(x, w1_t, b1, w2_t, b2, block_rows=8)
    out = jax.block_until_ready(out)

    # Pure-JAX reference (eval mode: dropout is identity; exact GELU).
    h_ref = x @ w1.T + b1
    h_ref = jax.nn.gelu(h_ref, approximate=False)
    ref = h_ref @ w2.T + b2

    assert out.shape == (B, S, d_model)
    assert jnp.allclose(out, ref, atol=1e-3, rtol=1e-3), "mismatch vs reference"

    print("KERNEL_OK")
</pallas_src>

<mosaic_0001>
module attributes {stable_mosaic.version = 11 : i64} {
  func.func @feed_forward_kernel(%arg0: i32, %arg1: memref<8x128xf32, #tpu.memory_space<vmem>>, %arg2: memref<128x256xf32, #tpu.memory_space<vmem>>, %arg3: memref<1x256xf32, #tpu.memory_space<vmem>>, %arg4: memref<256x128xf32, #tpu.memory_space<vmem>>, %arg5: memref<1x128xf32, #tpu.memory_space<vmem>>, %arg6: memref<8x128xf32, #tpu.memory_space<vmem>>) attributes {dimension_semantics = [#tpu.dimension_semantics<parallel>], iteration_bounds = array<i64: 2>, scalar_prefetch = 0 : i64, scratch_operands = 0 : i64, tpu.core_type = #tpu.core_type<tc>, window_params = [{transform_indices = @transform_0, window_bounds = array<i64: 8, 128>}, {pipeline_mode = #tpu.pipeline_mode<synchronous>, transform_indices = @transform_1, window_bounds = array<i64: 128, 256>}, {pipeline_mode = #tpu.pipeline_mode<synchronous>, transform_indices = @transform_2, window_bounds = array<i64: 1, 256>}, {pipeline_mode = #tpu.pipeline_mode<synchronous>, transform_indices = @transform_3, window_bounds = array<i64: 256, 128>}, {pipeline_mode = #tpu.pipeline_mode<synchronous>, transform_indices = @transform_4, window_bounds = array<i64: 1, 128>}, {transform_indices = @transform_5, window_bounds = array<i64: 8, 128>}]} {
    %c0 = arith.constant 0 : index
    %c0_0 = arith.constant 0 : index
    %0 = vector.load %arg1[%c0, %c0_0] : memref<8x128xf32, #tpu.memory_space<vmem>>, vector<8x128xf32>
    %c0_1 = arith.constant 0 : index
    %c0_2 = arith.constant 0 : index
    %1 = vector.load %arg2[%c0_1, %c0_2] : memref<128x256xf32, #tpu.memory_space<vmem>>, vector<128x256xf32>
    %cst = arith.constant dense<0.000000e+00> : vector<8x256xf32>
    %2 = tpu.matmul %0, %1, %cst {dimension_numbers = #tpu.dot_dimension_numbers<[1], [0], [0], [1], [0, 0, 1, 1], [], []>} : vector<8x128xf32>, vector<128x256xf32>, vector<8x256xf32> -> vector<8x256xf32>
    %c0_3 = arith.constant 0 : index
    %c0_4 = arith.constant 0 : index
    %3 = vector.load %arg3[%c0_3, %c0_4] : memref<1x256xf32, #tpu.memory_space<vmem>>, vector<1x256xf32>
    %4 = vector.broadcast %3 : vector<1x256xf32> to vector<8x256xf32>
    %5 = arith.addf %2, %4 : vector<8x256xf32>
    %cst_5 = arith.constant 5.000000e-01 : f32
    %6 = vector.broadcast %cst_5 : f32 to vector<8x256xf32>
    %7 = arith.mulf %6, %5 : vector<8x256xf32>
    %cst_6 = arith.constant 0.707106769 : f32
    %8 = vector.broadcast %cst_6 : f32 to vector<8x256xf32>
    %9 = arith.mulf %5, %8 : vector<8x256xf32>
    %10 = math.absf %9 : vector<8x256xf32>
    %cst_7 = arith.constant 0.327591091 : f32
    %11 = vector.broadcast %cst_7 : f32 to vector<8x256xf32>
    %12 = arith.mulf %11, %10 : vector<8x256xf32>
    %cst_8 = arith.constant 1.000000e+00 : f32
    %13 = vector.broadcast %cst_8 : f32 to vector<8x256xf32>
    %14 = arith.addf %13, %12 : vector<8x256xf32>
    %cst_9 = arith.constant 1.000000e+00 : f32
    %15 = vector.broadcast %cst_9 : f32 to vector<8x256xf32>
    %16 = arith.divf %15, %14 : vector<8x256xf32>
    %cst_10 = arith.constant 1.06140542 : f32
    %17 = vector.broadcast %cst_10 : f32 to vector<8x256xf32>
    %18 = arith.mulf %17, %16 : vector<8x256xf32>
    %cst_11 = arith.constant -1.45315206 : f32
    %19 = vector.broadcast %cst_11 : f32 to vector<8x256xf32>
    %20 = arith.addf %18, %19 : vector<8x256xf32>
    %21 = arith.mulf %20, %16 : vector<8x256xf32>
    %cst_12 = arith.constant 1.42141378 : f32
    %22 = vector.broadcast %cst_12 : f32 to vector<8x256xf32>
    %23 = arith.addf %21, %22 : vector<8x256xf32>
    %24 = arith.mulf %23, %16 : vector<8x256xf32>
    %cst_13 = arith.constant -0.284496725 : f32
    %25 = vector.broadcast %cst_13 : f32 to vector<8x256xf32>
    %26 = arith.addf %24, %25 : vector<8x256xf32>
    %27 = arith.mulf %26, %16 : vector<8x256xf32>
    %cst_14 = arith.constant 0.254829586 : f32
    %28 = vector.broadcast %cst_14 : f32 to vector<8x256xf32>
    %29 = arith.addf %27, %28 : vector<8x256xf32>
    %30 = arith.mulf %29, %16 : vector<8x256xf32>
    %cst_15 = arith.constant 0.000000e+00 : f32
    %31 = vector.broadcast %cst_15 : f32 to vector<8x256xf32>
    %32 = arith.subf %31, %10 : vector<8x256xf32>
    %33 = arith.mulf %32, %10 : vector<8x256xf32>
    %34 = math.exp %33 : vector<8x256xf32>
    %35 = arith.mulf %30, %34 : vector<8x256xf32>
    %cst_16 = arith.constant 1.000000e+00 : f32
    %36 = vector.broadcast %cst_16 : f32 to vector<8x256xf32>
    %37 = arith.subf %36, %35 : vector<8x256xf32>
    %cst_17 = arith.constant 0.000000e+00 : f32
    %38 = vector.broadcast %cst_17 : f32 to vector<8x256xf32>
    %39 = arith.cmpf oge, %9, %38 : vector<8x256xf32>
    %cst_18 = arith.constant 0.000000e+00 : f32
    %40 = vector.broadcast %cst_18 : f32 to vector<8x256xf32>
    %41 = arith.subf %40, %37 : vector<8x256xf32>
    %42 = arith.select %39, %37, %41 : vector<8x256xi1>, vector<8x256xf32>
    %cst_19 = arith.constant 1.000000e+00 : f32
    %43 = vector.broadcast %cst_19 : f32 to vector<8x256xf32>
    %44 = arith.addf %43, %42 : vector<8x256xf32>
    %45 = arith.mulf %7, %44 : vector<8x256xf32>
    %c0_20 = arith.constant 0 : index
    %c0_21 = arith.constant 0 : index
    %46 = vector.load %arg4[%c0_20, %c0_21] : memref<256x128xf32, #tpu.memory_space<vmem>>, vector<256x128xf32>
    %cst_22 = arith.constant dense<0.000000e+00> : vector<8x128xf32>
    %47 = tpu.matmul %45, %46, %cst_22 {dimension_numbers = #tpu.dot_dimension_numbers<[1], [0], [0], [1], [0, 0, 1, 1], [], []>} : vector<8x256xf32>, vector<256x128xf32>, vector<8x128xf32> -> vector<8x128xf32>
    %c0_23 = arith.constant 0 : index
    %c0_24 = arith.constant 0 : index
    %48 = vector.load %arg5[%c0_23, %c0_24] : memref<1x128xf32, #tpu.memory_space<vmem>>, vector<1x128xf32>
    %49 = vector.broadcast %48 : vector<1x128xf32> to vector<8x128xf32>
    %50 = arith.addf %47, %49 : vector<8x128xf32>
    %c0_25 = arith.constant 0 : index
    %c0_26 = arith.constant 0 : index
    %51 = vector.load %arg6[%c0_25, %c0_26] : memref<8x128xf32, #tpu.memory_space<vmem>>, vector<8x128xf32>
    tpu.vector_store %arg6[%c0_25, %c0_26], %50 {strides = array<i32>} : memref<8x128xf32, #tpu.memory_space<vmem>>, vector<8x128xf32>,
    return
  }
  func.func @transform_0(%arg0: i32) -> (i32, i32) {
    %c0_i32 = arith.constant 0 : i32
    %c0_i32_0 = arith.constant 0 : i32
    return %arg0, %c0_i32 : i32, i32
  }
  func.func @transform_1(%arg0: i32) -> (i32, i32) {
    %c0_i32 = arith.constant 0 : i32
    %c0_i32_0 = arith.constant 0 : i32
    %c0_i32_1 = arith.constant 0 : i32
    return %c0_i32, %c0_i32_0 : i32, i32
  }
  func.func @transform_2(%arg0: i32) -> (i32, i32) {
    %c0_i32 = arith.constant 0 : i32
    %c0_i32_0 = arith.constant 0 : i32
    %c0_i32_1 = arith.constant 0 : i32
    return %c0_i32, %c0_i32_0 : i32, i32
  }
  func.func @transform_3(%arg0: i32) -> (i32, i32) {
    %c0_i32 = arith.constant 0 : i32
    %c0_i32_0 = arith.constant 0 : i32
    %c0_i32_1 = arith.constant 0 : i32
    return %c0_i32, %c0_i32_0 : i32, i32
  }
  func.func @transform_4(%arg0: i32) -> (i32, i32) {
    %c0_i32 = arith.constant 0 : i32
    %c0_i32_0 = arith.constant 0 : i32
    %c0_i32_1 = arith.constant 0 : i32
    return %c0_i32, %c0_i32_0 : i32, i32
  }
  func.func @transform_5(%arg0: i32) -> (i32, i32) {
    %c0_i32 = arith.constant 0 : i32
    %c0_i32_0 = arith.constant 0 : i32
    return %arg0, %c0_i32 : i32, i32
  }
}

</mosaic_0001>

<bundles_post_ra>
// kernel: tpu_custom_call.1
= control target key start
LH: loop header
LB: loop body
LE: loop exit
PB: predicated region body
PF: predicated region fallthrough
CT: control target
= control target key end

     0   :  { %10 = vsyncpa [#allocation3], 0  ;;  %s1287_s0 = inlined_call_operand.hbm [shape: f32[16,128], index: 0, kind: input, shape index: {}]   ;;  %s1288_s1 = inlined_call_operand.hbm [shape: f32[128,256], index: 1, kind: input, shape index: {}]   ;;  %s1289_s2 = inlined_call_operand.vmem [shape: f32[1,256], index: 2, kind: input, shape index: {}]   ;;  %s1290_s3 = inlined_call_operand.hbm [shape: f32[256,128], index: 3, kind: input, shape index: {}]   ;;  %s1291_s4 = inlined_call_operand.vmem [shape: f32[1,128], index: 4, kind: input, shape index: {}]   ;;  %s1292_s5 = inlined_call_operand.hbm [shape: f32[16,128], index: 5, kind: output, shape index: {}]  }
   0x1   :  { %12 = vsyncpa [#allocation3 + $0x1], 0 }
   0x2   :  { %13 = vsyncpa [#allocation6], 0 }
   0x3   :  { %14 = vsyncpa [#allocation4], 0 }
   0x4   :  { %16 = vsyncpa [#allocation4 + $0x1], 0  ;;  %s1045_s18 = smov 0   ;;  %s1047_s19 = smov 0  }
   0x5   :  { %s1049_s20 = smov 0   ;;  %s1051_s21 = smov 0  }
   0x6 LB: > { %s1066_s22 = sadd.s32 4294967295, %s1004_s21   ;;  %s652_s23 = sadd.s32 4294967294, %s1004_s21   ;;  %s1004_s21 = sphi %s1051_s21, %s1312_s21   ;;  %s1000_s20 = sphi %s1049_s20, %s1311_s20   ;;  %s996_s19 = sphi %s1047_s19, %s1310_s19   ;;  %s992_s18 = sphi %s1045_s18, %s1309_s18  }
   0x7   : > { %p42_p0 = scmp.ne.s32.totalorder %s996_s19, %s992_s18  ;;  %p1293_p1 = scmp.eq.s32.totalorder %s1066_s22, 0 }
   0x8   : > { %p156_p3 = scmp.eq.s32.totalorder %s652_s23, 1  ;;  %p653_p5 = scmp.ge.s32.totalorder %s1004_s21, 1 }
   0x9   : > { %p1075_p4 = por %p1293_p1, %p42_p0  ;;  %p163_p7 = scmp.lt.s32.totalorder %s1004_s21, 3 }
   0xa   : > { %p1080_p6 = por %p156_p3, %p42_p0  ;;  %s1006_s27 = smov [#allocation5]  }
   0xb   : > { %s1296_s24 = scalar_select %p1075_p4, 1, 0 }
   0xc   : > { %s1297_s25 = scalar_select %p1080_p6, 1, 0 }
   0xd   : > { %p1085_p8 = pnand %p653_p5, %p163_p7  ;;  %s175_s28 = sshll.u32 %s1006_s27, 4  ;;  %s1089_s28 = int_to_ptr.vmem [resolvable:$true] %s175_s28 }
   0xe   : > { %s1007_s30 = smov [#allocation7]   ;;  %s848_s9 = scalar_lea.hbm %s1288_s1, 4096 }
   0xf   : > { %p780_p9 = pneg %p1085_p8  ;;  %s191_s6 = sshll.u32 %s1007_s30, 4  ;;  %s1100_s6 = int_to_ptr.vmem [resolvable:$true] %s191_s6 }
  0x10   : > { %p849_p12 = scmp.ne.s32.totalorder %s1288_s1, %s848_s9  ;;  %p855_p5 = scmp.lt.u32.totalorder %s848_s9, %s1288_s1 }
  0x11   : > { %p1096_p11 = pnand %p780_p9, %p1293_p1 }
  0x13   : > { %p850_p13 = pneg %p1096_p11 }
  0x15   : > { %p851_p0 = pnand %p850_p13, %p849_p12 }
  0x17   : > { %p852_p3 = pneg %p851_p0 }
  0x19   : > { %p857_p7 = pnand %p855_p5, %p852_p3 }
  0x1b   : > { %860 = shalt.err (!%p857_p7)
}
  0x1c   : > { %s861_s14 = scalar_lea.vmem %s1089_s28, 4096  ;;  %p869_p2 = scmp.lt.s32.totalorder %s1089_s28, %s1089_s28 }
  0x1d   : > { %p862_p9 = scmp.ne.s32.totalorder %s1089_s28, %s861_s14  ;;  %p870_p12 = scmp.lt.s32.totalorder %s861_s14, %s861_s14 }
  0x1f   : > { %p864_p10 = pnand %p862_p9, %p850_p13  ;;  %p871_p0 = por %p870_p12, %p869_p2 }
  0x21   : > { %p865_p1 = pneg %p864_p10 }
  0x23   : > { %p872_p6 = pnand %p871_p0, %p865_p1 }
  0x25   : > { %875 = shalt.err (!%p872_p6)
}
  0x26   : > { %s1008_s15 = smov 256   ;;  %s1009_s16 = smov 16  }
  0x27   : > { %783 = dma.hbm_to_vmem [thread:$0]  (!%p1096_p11), %s1288_s1, 4096, %s1089_s28, [#allocation6], %s1008_s15, %s1008_s15, %s1009_s16  }
  0x28   : > { %s876_s7 = scalar_lea.hbm %s1290_s3, 4096 }
  0x29   : > { %p877_p2 = scmp.ne.s32.totalorder %s1290_s3, %s876_s7  ;;  %p883_p10 = scmp.lt.u32.totalorder %s876_s7, %s1290_s3 }
  0x2b   : > { %p879_p1 = pnand %p877_p2, %p850_p13 }
  0x2d   : > { %p880_p6 = pneg %p879_p1 }
  0x2f   : > { %p885_p3 = pnand %p883_p10, %p880_p6 }
  0x31   : > { %888 = shalt.err (!%p885_p3)
}
  0x32   : > { %s889_s28 = scalar_lea.vmem %s1100_s6, 4096  ;;  %p897_p12 = scmp.lt.s32.totalorder %s1100_s6, %s1100_s6 }
  0x33   : > { %p890_p5 = scmp.ne.s32.totalorder %s1100_s6, %s889_s28  ;;  %p898_p0 = scmp.lt.s32.totalorder %s889_s28, %s889_s28 }
  0x35   : > { %p892_p7 = pnand %p890_p5, %p850_p13  ;;  %p899_p2 = por %p898_p0, %p897_p12 }
  0x37   : > { %p893_p9 = pneg %p892_p7 }
  0x39   : > { %p900_p1 = pnand %p899_p2, %p893_p9 }
  0x3b   : > { %903 = shalt.err (!%p900_p1)
}
  0x3c   : > { %s1010_s12 = smov 128   ;;  %s1011_s13 = smov 8  }
  0x3d   : > { %786 = dma.hbm_to_vmem [thread:$0]  (!%p1096_p11), %s1290_s3, 4096, %s1100_s6, [#allocation6], %s1010_s12, %s1010_s12, %s1011_s13  }
  0x3e   : > { %s1155_s16 = sadd.s32 1, %s1004_s21   ;;  %s29_s23 = sadd.s32 1, %s1000_s20 }
  0x3f   : > { %s26_s17 = ssub.s32 %s1004_s21, %s1155_s16  ;;  %p36_p6 = scmp.ne.s32.totalorder %s1000_s20, %s996_s19 }
  0x40   : > { %p27_p13 = scmp.eq.s32.totalorder %s26_s17, 0  ;;  %p37_p10 = scmp.eq.s32.totalorder %s1004_s21, 0 }
  0x41   : > { %p1300_p5 = scmp.eq.s32.totalorder %s1066_s22, 1  ;;  %p797_p9 = scmp.lt.s32.totalorder %s1004_s21, 2 }
  0x42   : > { %s1164_s27 = scalar_select %p27_p13, %s1000_s20, %s29_s23  }
  0x43   : > { %p38_p3 = por %p37_p10, %p36_p6  ;;  %p1168_p7 = por %p1300_p5, %p36_p6 }
  0x44   : > { %s208_s29 = sand.u32 1, %s1000_s20   ;;  %s658_s6 = sshll.u32 %s1004_s21, 7 }
  0x45   : > { %s1301_s30 = scalar_select %p1168_p7, 1, 0 }
  0x46   : > { %s657_s7 = sshll.u32 %s208_s29, 3  ;;  %s1178_s10 = scalar_lea.hbm %s1287_s0, %s658_s6 }
  0x47   : > { %s212_s11 = scalar_lea.vmem [#allocation2], %s657_s7  ;;  %p1182_p11 = pnand %p797_p9, %p38_p3 }
  0x48   : > { %s219_s28 = sshll.u32 %s212_s11, 4  ;;  %s209_s13 = scalar_lea.sflag [#allocation3], %s208_s29  ;;  %s1180_s28 = int_to_ptr.vmem [resolvable:$true] %s219_s28 }
  0x49   : > { %s904_s14 = scalar_lea.hbm %s1178_s10, 128  ;;  %p906_p0 = pneg %p1182_p11 }
  0x4a   : > { %p905_p12 = scmp.ne.s32.totalorder %s1178_s10, %s904_s14  ;;  %s909_s23 = scalar_lea.hbm %s1287_s0, 256 }
  0x4b   : > { %p910_p13 = scmp.lt.u32.totalorder %s1178_s10, %s1287_s0  ;;  %p911_p6 = scmp.lt.u32.totalorder %s909_s23, %s904_s14 }
  0x4c   : > { %p907_p2 = pnand %p906_p0, %p905_p12  ;;  %p913_p3 = scmp.lt.u32.totalorder %s904_s14, %s1178_s10 }
  0x4d   : > { %p912_p10 = por %p911_p6, %p910_p13 }
  0x4e   : > { %p908_p1 = pneg %p907_p2 }
  0x4f   : > { %p914_p5 = por %p913_p3, %p912_p10 }
  0x51   : > { %p915_p9 = pnand %p914_p5, %p908_p1 }
  0x53   : > { %918 = shalt.err (!%p915_p9)
}
  0x54   : > { %s919_s29 = scalar_lea.vmem %s1180_s28, 128  ;;  %s1012_s8 = smov [#allocation2]  }
  0x55   : > { %p920_p12 = scmp.ne.s32.totalorder %s1180_s28, %s919_s29  ;;  %s924_s9 = sshll.u32 %s1012_s8, 4  ;;  %s925_s9 = int_to_ptr.vmem [resolvable:$false] %s924_s9 }
  0x56   : > { %s926_s11 = scalar_lea.vmem %s925_s9, 256  ;;  %p927_p4 = scmp.lt.s32.totalorder %s1180_s28, %s925_s9 }
  0x57   : > { %p922_p2 = pnand %p920_p12, %p906_p0  ;;  %p928_p13 = scmp.lt.s32.totalorder %s926_s11, %s919_s29 }
  0x59   : > { %p923_p7 = pneg %p922_p2  ;;  %p929_p6 = por %p928_p13, %p927_p4 }
  0x5b   : > { %p930_p10 = pnand %p929_p6, %p923_p7 }
  0x5d   : > { %933 = shalt.err (!%p930_p10)
}
  0x5e   : > { %790 = dma.hbm_to_vmem [thread:$0]  (!%p1182_p11), %s1178_s10, 128, %s1180_s28, %s209_s13  }
  0x5f   : > { %228 = sbr.rel (%p1085_p8) target bundleno = 636 (0x27c), region = 40  ;;  %s1214_s14 = sand.u32 (!%p1085_p8), 1, %s996_s19  }
  0x60   : > { %s660_s15 = sshll.u32 (!%p1085_p8), %s1214_s14, 3  ;;  %s231_s17 = scalar_lea.sflag (!%p1085_p8), [#allocation3], %s1214_s14 }
  0x61   : > { %s1220_s23 = scalar_lea.vmem (!%p1085_p8), [#allocation2], %s660_s15  ;;  %p1303_p4 = scmp.ne.s32.totalorder (!%p1085_p8), %s1296_s24, 0 }
  0x66   : > { %979 = dma.done.wait (%p1303_p4), %s231_s17, 128  }
  0x67   : > { %981 = vsyncadd (%p1303_p4), %s231_s17, 4294967168  ;;  %p1304_p7 = scmp.eq.s32.totalorder %s1066_s22, 0 }
  0x69   : > { %983 = dma.done.wait (%p1304_p7), [#allocation6], 8192   ;;  %p1305_p8 = pmov %p1304_p7 }
  0x6a   : > { %v1013_v0 = vmov 0.0   ;;  %v271_v1 = vld [vmem:[#allocation5 + $0x8] sm:$0xff]  ;;  %v273_v2 = vld [vmem:[#allocation5 + $0x18] sm:$0xff]  ;;  %v270_v3 = vld [vmem:[#allocation5] sm:$0xff]  ;;  %s666_s12 = sshll.u32 %s1066_s22, 7  ;;  %s268_s13 = scalar_lea.vmem [#allocation8], %s660_s15 }
  0x6b   : > { %985 = vsyncadd (%p1305_p8), [#allocation6], 4294959104  ;;  %378 = vmatprep.mubr.f32.mxu0 %v1013_v0  ;;  %v704_v4 = vpack.c.bf16 %v273_v2, %v271_v1  ;;  %v272_v5 = vld [vmem:[#allocation5 + $0x10] sm:$0xff]  ;;  %v275_v6 = vld [vmem:[#allocation5 + $0x28] sm:$0xff]  ;;  %s563_s7 = sshll.u32 %s268_s13, 4  ;;  %s1243_s8 = scalar_lea.hbm %s1292_s5, %s666_s12  ;;  %s1245_s7 = int_to_ptr.vmem [resolvable:$true] %s563_s7 }
  0x6c   : > { %v277_v7 = vld [vmem:[#allocation5 + $0x38] sm:$0xff]  ;;  %v706_v8 = vpack.c.bf16 %v272_v5, %v270_v3  ;;  %v274_v10 = vld [vmem:[#allocation5 + $0x20] sm:$0xff]  ;;  %v276_v11 = vld [vmem:[#allocation5 + $0x30] sm:$0xff]  ;;  %s550_s9 = scalar_lea.sflag [#allocation4], %s1214_s14  ;;  %s934_s11 = scalar_lea.vmem %s1245_s7, 128 }
  0x6d   : > { %v708_v9 = vpack.c.bf16 %v277_v7, %v275_v6  ;;  %v279_v12 = vld [vmem:[#allocation5 + $0x48] sm:$0xff]  ;;  %705 = vmatprep.subr.bf16.mxu0 %v704_v4  ;;  %v281_v13 = vld [vmem:[#allocation5 + $0x58] sm:$0xff]  ;;  %v710_v14 = vpack.c.bf16 %v276_v11, %v274_v10  ;;  %v278_v16 = vld [vmem:[#allocation5 + $0x40] sm:$0xff]  ;;  %p935_p11 = scmp.ne.s32.totalorder %s1245_s7, %s934_s11  ;;  %p1306_p0 = scmp.ne.s32.totalorder %s1301_s30, 0 }
  0x6e   : > { %707 = vmatpush1.bf16.msra.mxu0 %v706_v8  ;;  %v712_v15 = vpack.c.bf16 %v281_v13, %v279_v12  ;;  %v280_v17 = vld [vmem:[#allocation5 + $0x50] sm:$0xff]  ;;  %v283_v18 = vld [vmem:[#allocation5 + $0x68] sm:$0xff]  ;;  %v285_v19 = vld [vmem:[#allocation5 + $0x78] sm:$0xff]  ;;  %s1014_s22 = smov [#allocation8]  }
  0x6f   : > { %709 = vmatprep.subr.bf16.mxu0 %v708_v9  ;;  %v714_v20 = vpack.c.bf16 %v280_v17, %v278_v16  ;;  %v716_v21 = vpack.c.bf16 %v285_v19, %v283_v18  ;;  %v282_v22 = vld [vmem:[#allocation5 + $0x60] sm:$0xff]  ;;  %v284_v23 = vld [vmem:[#allocation5 + $0x70] sm:$0xff]  ;;  %v287_v24 = vld [vmem:[#allocation5 + $0x88] sm:$0xff]  ;;  %p936_p1 = pnand %p935_p11, %p1306_p0  ;;  %s938_s15 = sshll.u32 %s1014_s22, 4  ;;  %s939_s15 = int_to_ptr.vmem [resolvable:$false] %s938_s15 }
  0x70   : > { %v289_v25 = vld [vmem:[#allocation5 + $0x98] sm:$0xff]  ;;  %v718_v26 = vpack.c.bf16 %v284_v23, %v282_v22  ;;  %v286_v28 = vld [vmem:[#allocation5 + $0x80] sm:$0xff]  ;;  %v288_v29 = vld [vmem:[#allocation5 + $0x90] sm:$0xff]  ;;  %s940_s17 = scalar_lea.vmem %s939_s15, 256  ;;  %p941_p5 = scmp.lt.s32.totalorder %s1245_s7, %s939_s15 }
  0x71   : > { %v720_v27 = vpack.c.bf16 %v289_v25, %v287_v24  ;;  %v291_v30 = vld [vmem:[#allocation5 + $0xa8] sm:$0xff]  ;;  %v293_v31 = vld [vmem:[#allocation5 + $0xb8] sm:$0xff]  ;;  %v722_v32 = vpack.c.bf16 %v288_v29, %v286_v28  ;;  %v290_v34 = vld [vmem:[#allocation5 + $0xa0] sm:$0xff]  ;;  %p937_p3 = pneg %p936_p1  ;;  %p942_p9 = scmp.lt.s32.totalorder %s940_s17, %s934_s11 }
  0x72   : > { %711 = vmatpush1.bf16.msra.mxu0 %v710_v14  ;;  %v724_v33 = vpack.c.bf16 %v293_v31, %v291_v30  ;;  %v292_v35 = vld [vmem:[#allocation5 + $0xb0] sm:$0xff]  ;;  %v295_v36 = vld [vmem:[#allocation5 + $0xc8] sm:$0xff]  ;;  %v297_v37 = vld [vmem:[#allocation5 + $0xd8] sm:$0xff] }
  0x73   : > { %713 = vmatprep.subr.bf16.mxu0 %v712_v15  ;;  %v726_v38 = vpack.c.bf16 %v292_v35, %v290_v34  ;;  %v728_v39 = vpack.c.bf16 %v297_v37, %v295_v36  ;;  %v294_v40 = vld [vmem:[#allocation5 + $0xc0] sm:$0xff]  ;;  %v296_v41 = vld [vmem:[#allocation5 + $0xd0] sm:$0xff]  ;;  %v299_v42 = vld [vmem:[#allocation5 + $0xe8] sm:$0xff]  ;;  %v304_v34 = vlaneseq  ;;  %p943_p12 = por %p942_p9, %p941_p5 }
  0x74   : > { %v301_v43 = vld [vmem:[#allocation5 + $0xf8] sm:$0xff]  ;;  %v730_v44 = vpack.c.bf16 %v296_v41, %v294_v40  ;;  %v298_v46 = vld [vmem:[#allocation5 + $0xe0] sm:$0xff]  ;;  %v300_v47 = vld [vmem:[#allocation5 + $0xf0] sm:$0xff] }
  0x75   : > { %v732_v45 = vpack.c.bf16 %v301_v43, %v299_v42  ;;  %v734_v48 = vpack.c.bf16 %v300_v47, %v298_v46  ;;  %v269_v49 = vld [vmem:[%s1220_s23] sm:$0xff]  ;;  %v455_v50 = vld [vmem:[#allocation7 + $0x80] sm:$0xff]  ;;  %v456_v51 = vld [vmem:[#allocation7 + $0x88] sm:$0xff]  ;;  %v305_v35 = vshrl.u32 %v304_v34, 7  ;;  %p944_p2 = pnand %p943_p12, %p937_p3 }
  0x76   : > { %715 = vmatpush1.bf16.msra.mxu0 %v714_v20  ;;  %v439_v52 = vld [vmem:[#allocation7] sm:$0xff]  ;;  %v736_v53 = vpack.c.bf16 %v456_v51, %v455_v50  ;;  %v440_v54 = vld [vmem:[#allocation7 + $0x8] sm:$0xff]  ;;  %v457_v55 = vld [vmem:[#allocation7 + $0x90] sm:$0xff] }
  0x77   : > { %717 = vmatprep.subr.bf16.mxu0 %v716_v21  ;;  %v458_v56 = vld [vmem:[#allocation7 + $0x98] sm:$0xff]  ;;  %v738_v57 = vpack.c.bf16 %v440_v54, %v439_v52  ;;  %v441_v59 = vld [vmem:[#allocation7 + $0x10] sm:$0xff]  ;;  %v459_v61 = vld [vmem:[#allocation7 + $0xa0] sm:$0xff]  ;;  %v306_v36 = vsub.s32 0, %v305_v35 }
  0x78   : > { %v740_v58 = vpack.c.bf16 %v458_v56, %v457_v55  ;;  %v442_v60 = vld [vmem:[#allocation7 + $0x18] sm:$0xff]  ;;  %737 = vmatprep.subr.bf16.mxu1 %v736_v53  ;;  %v460_v62 = vld [vmem:[#allocation7 + $0xa8] sm:$0xff]  ;;  %v443_v1 = vld [vmem:[#allocation7 + $0x20] sm:$0xff] }
  0x79   : > { %739 = vmatpush3.bf16.msra.mxu1 %v738_v57  ;;  %v742_v63 = vpack.c.bf16 %v442_v60, %v441_v59  ;;  %v744_v0 = vpack.c.bf16 %v460_v62, %v459_v61  ;;  %v444_v2 = vld [vmem:[#allocation7 + $0x28] sm:$0xff]  ;;  %v461_v3 = vld [vmem:[#allocation7 + $0xb0] sm:$0xff]  ;;  %v462_v4 = vld [vmem:[#allocation7 + $0xb8] sm:$0xff] }
  0x7a   : > { %719 = vmatpush1.bf16.msra.mxu0 %v718_v26  ;;  %741 = vmatprep.subr.bf16.mxu1 %v740_v58  ;;  %v746_v5 = vpack.c.bf16 %v444_v2, %v443_v1  ;;  %v748_v6 = vpack.c.bf16 %v462_v4, %v461_v3  ;;  %v445_v7 = vld [vmem:[#allocation7 + $0x30] sm:$0xff]  ;;  %v446_v8 = vld [vmem:[#allocation7 + $0x38] sm:$0xff]  ;;  %v463_v9 = vld [vmem:[#allocation7 + $0xc0] sm:$0xff] }
  0x7b   : > { %721 = vmatprep.subr.bf16.mxu0 %v720_v27  ;;  %v464_v10 = vld [vmem:[#allocation7 + $0xc8] sm:$0xff]  ;;  %v750_v11 = vpack.c.bf16 %v446_v8, %v445_v7  ;;  %v447_v13 = vld [vmem:[#allocation7 + $0x40] sm:$0xff]  ;;  %v465_v15 = vld [vmem:[#allocation7 + $0xd0] sm:$0xff] }
  0x7c   : > { %v752_v12 = vpack.c.bf16 %v464_v10, %v463_v9  ;;  %v448_v14 = vld [vmem:[#allocation7 + $0x48] sm:$0xff]  ;;  %v466_v16 = vld [vmem:[#allocation7 + $0xd8] sm:$0xff]  ;;  %v449_v19 = vld [vmem:[#allocation7 + $0x50] sm:$0xff] }
  0x7d   : > { %743 = vmatpush3.bf16.msra.mxu1 %v742_v63  ;;  %v754_v17 = vpack.c.bf16 %v448_v14, %v447_v13  ;;  %v756_v18 = vpack.c.bf16 %v466_v16, %v465_v15  ;;  %v450_v20 = vld [vmem:[#allocation7 + $0x58] sm:$0xff]  ;;  %v467_v21 = vld [vmem:[#allocation7 + $0xe0] sm:$0xff]  ;;  %v468_v22 = vld [vmem:[#allocation7 + $0xe8] sm:$0xff] }
  0x7e   : > { %723 = vmatpush1.bf16.msra.mxu0 %v722_v32  ;;  %745 = vmatprep.subr.bf16.mxu1 %v744_v0  ;;  %v758_v23 = vpack.c.bf16 %v450_v20, %v449_v19  ;;  %v760_v24 = vpack.c.bf16 %v468_v22, %v467_v21  ;;  %v451_v25 = vld [vmem:[#allocation7 + $0x60] sm:$0xff]  ;;  %v452_v26 = vld [vmem:[#allocation7 + $0x68] sm:$0xff]  ;;  %v469_v27 = vld [vmem:[#allocation7 + $0xf0] sm:$0xff] }
  0x7f   : > { %725 = vmatprep.subr.bf16.mxu0 %v724_v33  ;;  %v470_v28 = vld [vmem:[#allocation7 + $0xf8] sm:$0xff]  ;;  %v762_v29 = vpack.c.bf16 %v452_v26, %v451_v25  ;;  %v453_v31 = vld [vmem:[#allocation7 + $0x70] sm:$0xff] }
  0x80   : > { %v764_v30 = vpack.c.bf16 %v470_v28, %v469_v27  ;;  %v454_v32 = vld [vmem:[#allocation7 + $0x78] sm:$0xff]  ;;  %v302_v37 = vld [vmem:[%s1289_s2] sm:$0x3] }
  0x81   : > { %747 = vmatpush3.bf16.msra.mxu1 %v746_v5  ;;  %v766_v33 = vpack.c.bf16 %v454_v32, %v453_v31  ;;  %v664_v32 = vld [vmem:[%s1291_s4] ss:$0 sm:$0xff] }
  0x82   : > { %727 = vmatpush1.bf16.msra.mxu0 %v726_v38  ;;  %749 = vmatprep.subr.bf16.mxu1 %v748_v6  ;;  %v310_v38 = vsub.s32 1, %v305_v35 }
  0x83   : > { %729 = vmatprep.subr.bf16.mxu0 %v728_v39  ;;  %v307_v39 = vrot.slane %v302_v37, %v306_v36 }
  0x84   : > { %v311_v40 = vrot.slane %v302_v37, %v310_v38 }
  0x85   : > { %751 = vmatpush3.bf16.msra.mxu1 %v750_v11 }
  0x86   : > { %731 = vmatpush1.bf16.msra.mxu0 %v730_v44  ;;  %753 = vmatprep.subr.bf16.mxu1 %v752_v12 }
  0x87   : > { %733 = vmatprep.subr.bf16.mxu0 %v732_v45 }
  0x89   : > { %755 = vmatpush3.bf16.msra.mxu1 %v754_v17 }
  0x8a   : > { %735 = vmatpush1.bf16.msra.mxu0 %v734_v48  ;;  %757 = vmatprep.subr.bf16.mxu1 %v756_v18 }
  0x8d   : > { %379 = vmatmul.mubr.f32.vlgmr.msra.gmra.mrb[0].mxu0 %v269_v49  ;;  %759 = vmatpush3.bf16.msra.mxu1 %v758_v23 }
  0x8e   : > { %761 = vmatprep.subr.bf16.mxu1 %v760_v24 }
  0x91   : > { %763 = vmatpush3.bf16.msra.mxu1 %v762_v29 }
  0x92   : > { %765 = vmatprep.subr.bf16.mxu1 %v764_v30 }
  0x95   : > { %767 = vmatpush3.bf16.msra.mxu1 %v766_v33 }
 0x160   : > { %v380_v41 = vpop.f32.mrb[0].mxu0 }
 0x161   : > { %v381_v42 = vadd.f32 %v380_v41, %v307_v39  ;;  %v382_v43 = vpop.f32.mrb[1].mxu0 }
 0x162   : > { %v383_v44 = vadd.f32 %v382_v43, %v311_v40 }
 0x163   : > { %v387_v45 = vmul.f32 0.70710677, %v381_v42  ;;  %v385_v28 = vmul.f32 0.5, %v381_v42 }
 0x164   : > { %v388_v46 = vmul.f32 0.70710677, %v383_v44  ;;  %v386_v26 = vmul.f32 0.5, %v383_v44 }
 0x165   : > { %v389_v47 = vand.u32 2147483647, %v387_v45  ;;  %vm429_vm0 = vcmp.ge.f32.partialorder %v387_v45, 0.0 }
 0x166   : > { %v390_v48 = vand.u32 2147483647, %v388_v46  ;;  %vm430_vm1 = vcmp.ge.f32.partialorder %v388_v46, 0.0 }
 0x167   : > { %v391_v49 = vmul.f32 0.3275911, %v389_v47  ;;  %v417_v53 = vsub.f32 0.0, %v389_v47 }
 0x168   : > { %v392_v50 = vmul.f32 0.3275911, %v390_v48  ;;  %v418_v54 = vsub.f32 0.0, %v390_v48 }
 0x169   : > { %v393_v51 = vadd.f32 1.0, %v391_v49  ;;  %v419_v56 = vmul.f32 %v417_v53, %v389_v47 }
 0x16a   : > { %v394_v52 = vadd.f32 1.0, %v392_v50  ;;  %v420_v58 = vmul.f32 %v418_v54, %v390_v48 }
 0x16b   : > { %840 = vrcp.f32 %v393_v51  ;;  %v421_v62 = vmul.f32 1.442695, %v419_v56 }
 0x16c   : > { %842 = vrcp.f32 %v394_v52  ;;  %v423_v0 = vmul.f32 1.442695, %v420_v58 }
 0x16d   : > { %844 = vpow2.f32 %v421_v62 }
 0x16e   : > { %846 = vpow2.f32 %v423_v0 }
 0x175   : > { %v841_v55 = vpop.eup %840 }
 0x176   : > { %v843_v57 = vpop.eup %842  ;;  %v399_v59 = vmul.f32 1.0614054, %v841_v55 }
 0x177   : > { %v400_v60 = vmul.f32 1.0614054, %v843_v57  ;;  %v845_v14 = vpop.eup %844 }
 0x178   : > { %v401_v61 = vadd.f32 -1.4531521, %v399_v59  ;;  %v847_v16 = vpop.eup %846 }
 0x179   : > { %v402_v63 = vadd.f32 -1.4531521, %v400_v60 }
 0x17a   : > { %v403_v1 = vmul.f32 %v841_v55, %v401_v61 }
 0x17b   : > { %v404_v2 = vmul.f32 %v843_v57, %v402_v63 }
 0x17c   : > { %v405_v3 = vadd.f32 1.4214138, %v403_v1 }
 0x17d   : > { %v406_v4 = vadd.f32 1.4214138, %v404_v2 }
 0x17e   : > { %v407_v5 = vmul.f32 %v841_v55, %v405_v3 }
 0x17f   : > { %v408_v6 = vmul.f32 %v843_v57, %v406_v4 }
 0x180   : > { %v409_v7 = vadd.f32 -0.28449672, %v407_v5 }
 0x181   : > { %v410_v8 = vadd.f32 -0.28449672, %v408_v6 }
 0x182   : > { %v411_v9 = vmul.f32 %v841_v55, %v409_v7 }
 0x183   : > { %v412_v10 = vmul.f32 %v843_v57, %v410_v8 }
 0x184   : > { %v413_v11 = vadd.f32 0.2548296, %v411_v9 }
 0x185   : > { %v414_v12 = vadd.f32 0.2548296, %v412_v10 }
 0x186   : > { %v415_v13 = vmul.f32 %v841_v55, %v413_v11 }
 0x187   : > { %v416_v15 = vmul.f32 %v843_v57, %v414_v12 }
 0x188   : > { %v425_v17 = vmul.f32 %v845_v14, %v415_v13 }
 0x189   : > { %v426_v18 = vmul.f32 %v847_v16, %v416_v15 }
 0x18a   : > { %v427_v19 = vsub.f32 1.0, %v425_v17 }
 0x18b   : > { %v428_v20 = vsub.f32 1.0, %v426_v18 }
 0x18c   : > { %v431_v21 = vsub.f32 0.0, %v427_v19 }
 0x18d   : > { %v432_v22 = vsub.f32 0.0, %v428_v20 }
 0x18e   : > { %v433_v23 = vsel %vm429_vm0, %v427_v19, %v431_v21 }
 0x18f   : > { %v434_v24 = vsel %vm430_vm1, %v428_v20, %v432_v22  ;;  %v435_v25 = vadd.f32 1.0, %v433_v23 }
 0x190   : > { %v436_v27 = vadd.f32 1.0, %v434_v24 }
 0x191   : > { %v437_v30 = vmul.f32 %v435_v25, %v385_v28 }
 0x192   : > { %v438_v29 = vmul.f32 %v436_v27, %v386_v26 }
 0x194   : > { %542 = vmatprep.mubr.f32.mxu1 %v438_v29 }
 0x195   : > { %543 = vmatmul.mubr.f32.vlgmr.msra.gmra.mrb[0].mxu1 %v437_v30 }
 0x268   : > { %v701_v31 = vpop.f32.mrb[0].mxu1 }
 0x269   : > { %v702_v33 = vpop.f32.mrb[1].mxu1 }
 0x26a   : > { %v703_v34 = vadd.f32 %v702_v33, %v701_v31 }
 0x26c   : > { %v545_v35 = vadd.f32 %v703_v34, %v664_v32 }
 0x26e   : > { %548 = vst [vmem:[%s268_s13] sm:$0xff] %v545_v35 }
 0x26f   : > { %947 = shalt.err (!%p944_p2)
}
 0x270   : > { %s948_s14 = scalar_lea.hbm %s1243_s8, 128  ;;  %s952_s26 = scalar_lea.hbm %s1292_s5, 256 }
 0x271   : > { %p949_p13 = scmp.ne.s32.totalorder %s1243_s8, %s948_s14  ;;  %p953_p4 = scmp.lt.u32.totalorder %s1243_s8, %s1292_s5 }
 0x272   : > { %p954_p7 = scmp.lt.u32.totalorder %s952_s26, %s948_s14  ;;  %p956_p11 = scmp.lt.u32.totalorder %s948_s14, %s1243_s8 }
 0x273   : > { %p950_p6 = pnand %p949_p13, %p1306_p0 }
 0x274   : > { %p955_p8 = por %p954_p7, %p953_p4 }
 0x275   : > { %p951_p10 = pneg %p950_p6 }
 0x276   : > { %p957_p1 = por %p956_p11, %p955_p8 }
 0x278   : > { %p958_p3 = pnand %p957_p1, %p951_p10 }
 0x27a   : > { %961 = shalt.err (!%p958_p3)
}
 0x27b   : > { %778 = dma.vmem_to_hbm [thread:$0]  (%p1306_p0), %s1245_s7, 128, %s1243_s8, %s550_s9  }
 0x27c PF: > { %s575_s12 = sand.u32 1, %s992_s18   ;;  %p1307_p5 = scmp.ne.s32.totalorder %s1297_s25, 0 }
 0x27d   : > { %p1308_p9 = scmp.ge.s32.totalorder %s1004_s21, 2  ;;  %s576_s13 = scalar_lea.sflag [#allocation4], %s575_s12 }
 0x27f   : > { %p792_p12 = pnand %p1308_p9, %p1307_p5 }
 0x281   : > { %987 = dma.done.wait (!%p792_p12), %s576_s13, 128  }
 0x282   : > { %989 = vsyncadd (!%p792_p12), %s576_s13, 4294967168  ;;  %p19_p2 = scmp.ge.s32.totalorder %s1155_s16, 4   ;;  %s1309_s18 = smov %s996_s19 }
 0x283   : > { %s1310_s19 = smov %s1000_s20  ;;  %s1311_s20 = smov %s1164_s27 }
 0x284   : > { %s1312_s21 = smov %s1155_s16  ;;  %21 = sbr.rel (!%p19_p2) target bundleno = 6 (0x6), region = 93 }
 0x28b   :  { %581 = vsyncpa [#allocation3], 1 }
 0x28c   :  { %583 = vsyncpa [#allocation3 + $0x1], 1 }
 0x28d   :  { %584 = vsyncpa [#allocation6], 1 }
 0x28e   :  { %585 = vsyncpa [#allocation4], 1 }
 0x28f   :  { %587 = vsyncpa [#allocation4 + $0x1], 1 }

</bundles_post_ra>
